<compile_context>
chip_gen: v5e
topology: v5e:2x2
jax: 0.10.0
libtpu: 0.0.40
codegen_flags: <defaults>
</compile_context>

<pallas_src>
import functools
import math

import jax
import jax.numpy as jnp
from jax import lax
from jax.experimental import pallas as pl
from jax.experimental.pallas import tpu as pltpu


def _ceil_to(x: int, m: int) -> int:
    return ((x + m - 1) // m) * m


def _pick_tile(dim: int, candidates, align: int = 128, max_waste: float = 0.10) -> int:
    """Pick a tile size that keeps zero-padding waste low.

    If the whole axis fits in the largest candidate, use a single block rounded
    up to `align` (e.g. a small feature axis stays untiled).  Otherwise use the
    largest candidate whose padding waste is <= max_waste, falling back to the
    minimum-waste candidate.
    """
    dim = max(int(dim), 1)
    cands = sorted(set(candidates), reverse=True)
    if dim <= cands[0]:
        return min(_ceil_to(dim, align), cands[0])
    best_t, best_waste = None, None
    for t in cands:
        waste = (_ceil_to(dim, t) - dim) / dim
        if waste <= max_waste:
            return t
        if best_waste is None or waste < best_waste:
            best_t, best_waste = t, waste
    return best_t


def _is_v7_like() -> bool:
    try:
        kind = jax.devices()[0].device_kind
    except Exception:
        return False
    return "v7" in kind.lower()


def _resolve_activation(activation):
    """Map the module's `activation` (callable or name, possibly falsy) to a fn."""
    if not activation:
        return None
    if callable(activation):
        return activation
    if isinstance(activation, str):
        table = {
            "relu": lambda y: jnp.maximum(y, 0.0),
            "gelu": jax.nn.gelu,
            "elu": jax.nn.elu,
            "tanh": jnp.tanh,
            "sigmoid": jax.nn.sigmoid,
            "identity": lambda y: y,
            "none": lambda y: y,
        }
        name = activation.lower()
        if name in table:
            return table[name]
    raise ValueError(f"Unsupported activation: {activation!r}")


def _mlp_kernel_multi_k(x_ref, w_ref, o_ref, acc_ref, *, act_fn, compute_dtype):
    """One (tm, tn) tile of act(x @ W.T); reduction over grid axis 2 (K)."""
    k = pl.program_id(2)

    @pl.when(k == 0)
    def _():
        acc_ref[...] = jnp.zeros_like(acc_ref)

    xt = x_ref[...].astype(compute_dtype)          # (tm, tk)
    wt = w_ref[...].astype(compute_dtype)          # (tn, tk), native (H, K) layout
    acc_ref[...] += lax.dot_general(
        xt, wt,
        dimension_numbers=(((1,), (1,)), ((), ())),  # contract K with K  (x @ W.T)
        preferred_element_type=jnp.float32,
    )

    @pl.when(k == pl.num_programs(2) - 1)
    def _():
        y = acc_ref[...]
        if act_fn is not None:
            y = act_fn(y)
        o_ref[...] = y.astype(o_ref.dtype)


def _mlp_kernel_single_k(x_ref, w_ref, o_ref, *, act_fn, compute_dtype):
    """Whole reduction fits one tile: no scratch, direct write."""
    xt = x_ref[...].astype(compute_dtype)
    wt = w_ref[...].astype(compute_dtype)
    y = lax.dot_general(
        xt, wt,
        dimension_numbers=(((1,), (1,)), ((), ())),
        preferred_element_type=jnp.float32,
    )
    if act_fn is not None:
        y = act_fn(y)
    o_ref[...] = y.astype(o_ref.dtype)


def mlp_layer_forward(adj, x, weight, *, activation="relu",
                      compute_dtype=jnp.bfloat16,
                      tm=None, tn=None, tk=None):
    """Pallas forward of MLP_Layer: act(dropout(x) @ W.T).

    `adj` matches the module's forward signature but is unused (same as the
    PyTorch forward).  Dropout is treated as identity (inference mode).
    Inputs are fed to the MXU in bf16 with f32 accumulation; pass
    compute_dtype=jnp.float32 for full input precision.
    """
    del adj
    # TODO(synk): training-mode dropout (stochastic mask via pltpu.prng_*) not
    # implemented; eval-mode identity is used here.

    act_fn = _resolve_activation(activation)

    N, K = x.shape
    H, Kw = weight.shape
    assert K == Kw, "weight in_dim must match x feature dim"
    out_dtype = x.dtype

    # Pad-aware tile selection, 128-aligned (never 8-row sublane tiles).
    if tm is None:
        tm = _pick_tile(N, (512, 256, 128))
    if tn is None:
        tn = _pick_tile(H, (512, 256, 128))          # small H -> feature axis untiled
    if tk is None:
        tk = _pick_tile(K, (1024, 512, 256, 128))

    Mp, Kp, Hp = _ceil_to(N, tm), _ceil_to(K, tk), _ceil_to(H, tn)

    # v7x has 2 TensorCores: make sure the "parallel" axes have >= 2 blocks.
    if _is_v7_like() and (Mp // tm) * (Hp // tn) < 2 and tm > 128:
        tm //= 2
        Mp = _ceil_to(N, tm)

    # Pad only ragged shapes (zeros along K contribute nothing to the dot;
    # extra M / H rows are sliced off at the end).  No bf16 / transpose copies.
    xp = x if (Mp, Kp) == (N, K) else jnp.pad(x, ((0, Mp - N), (0, Kp - K)))
    wp = weight if (Hp, Kp) == (H, K) else jnp.pad(weight, ((0, Hp - H), (0, Kp - K)))

    n_i, n_j, n_k = Mp // tm, Hp // tn, Kp // tk

    itemsize = jnp.dtype(x.dtype).itemsize
    cost = pl.CostEstimate(
        flops=2 * Mp * Kp * Hp,
        transcendentals=0,
        bytes_accessed=(Mp * Kp + Hp * Kp) * itemsize
        + Mp * Hp * jnp.dtype(out_dtype).itemsize,
    )

    if n_k == 1:
        kernel = functools.partial(
            _mlp_kernel_single_k, act_fn=act_fn, compute_dtype=compute_dtype)
        grid_spec = pltpu.PrefetchScalarGridSpec(
            num_scalar_prefetch=0,
            grid=(n_i, n_j),
            in_specs=[
                pl.BlockSpec((tm, Kp), lambda i, j: (i, 0)),   # x tile, whole K
                pl.BlockSpec((tn, Kp), lambda i, j: (j, 0)),   # W tile, native (H, K)
            ],
            out_specs=pl.BlockSpec((tm, tn), lambda i, j: (i, j)),
        )
        dim_sem = ("parallel", "parallel")
    else:
        kernel = functools.partial(
            _mlp_kernel_multi_k, act_fn=act_fn, compute_dtype=compute_dtype)
        grid_spec = pltpu.PrefetchScalarGridSpec(
            num_scalar_prefetch=0,
            grid=(n_i, n_j, n_k),
            in_specs=[
                pl.BlockSpec((tm, tk), lambda i, j, k: (i, k)),  # x tile
                pl.BlockSpec((tn, tk), lambda i, j, k: (j, k)),  # W tile, native layout
            ],
            out_specs=pl.BlockSpec((tm, tn), lambda i, j, k: (i, j)),
            scratch_shapes=[pltpu.VMEM((tm, tn), jnp.float32)],
        )
        dim_sem = ("parallel", "parallel", "arbitrary")

    out = pl.pallas_call(
        kernel,
        out_shape=jax.ShapeDtypeStruct((Mp, Hp), out_dtype),
        grid_spec=grid_spec,
        compiler_params=pltpu.CompilerParams(dimension_semantics=dim_sem),
        cost_estimate=cost,
    )(xp, wp)

    if (Mp, Hp) != (N, H):
        out = out[:N, :H]
    return out


if __name__ == "__main__":
    key = jax.random.PRNGKey(0)
    k_adj, k_x, k_w = jax.random.split(key, 3)

    num_nodes = 256   # graph nodes (rows of x / adj)
    in_dim = 256      # input feature dim
    hid_dim = 128     # hidden (output) dim

    # adj is part of the module's forward signature but unused by it.
    adj_raw = jax.random.uniform(k_adj, (num_nodes, num_nodes), dtype=jnp.float32)
    adj = adj_raw / jnp.sum(adj_raw, axis=-1, keepdims=True)

    x = jax.random.normal(k_x, (num_nodes, in_dim), dtype=jnp.float32)

    # Xavier-uniform init with gain sqrt(2), matching reset_parameters().
    gain = math.sqrt(2.0)
    bound = gain * math.sqrt(6.0 / (in_dim + hid_dim))
    weight = jax.random.uniform(
        k_w, (hid_dim, in_dim), dtype=jnp.float32, minval=-bound, maxval=bound
    )

    out = mlp_layer_forward(adj, x, weight, activation="relu")
    out = jax.block_until_ready(out)

    # f32 reference; relaxed tolerance because the kernel feeds bf16 to the MXU.
    ref = jnp.maximum(x @ weight.T, 0.0)
    assert out.shape == (num_nodes, hid_dim)
    assert jnp.allclose(out, ref, atol=3e-2, rtol=3e-2), "mismatch vs reference"

    print("KERNEL_OK")
</pallas_src>

<mosaic_0001>
module attributes {stable_mosaic.version = 11 : i64} {
  func.func @_mlp_kernel_single_k(%arg0: i32, %arg1: i32, %arg2: memref<256x256xf32, #tpu.memory_space<vmem>>, %arg3: memref<128x256xf32, #tpu.memory_space<vmem>>, %arg4: memref<256x128xf32, #tpu.memory_space<vmem>>) attributes {dimension_semantics = [#tpu.dimension_semantics<parallel>, #tpu.dimension_semantics<parallel>], iteration_bounds = array<i64: 1, 1>, scalar_prefetch = 0 : i64, scratch_operands = 0 : i64, tpu.core_type = #tpu.core_type<tc>, window_params = [{transform_indices = @transform_0, window_bounds = array<i64: 256, 256>}, {transform_indices = @transform_1, window_bounds = array<i64: 128, 256>}, {transform_indices = @transform_2, window_bounds = array<i64: 256, 128>}]} {
    %c0 = arith.constant 0 : index
    %c0_0 = arith.constant 0 : index
    %0 = vector.load %arg2[%c0, %c0_0] : memref<256x256xf32, #tpu.memory_space<vmem>>, vector<256x256xf32>
    %1 = arith.truncf %0 : vector<256x256xf32> to vector<256x256xbf16>
    %c0_1 = arith.constant 0 : index
    %c0_2 = arith.constant 0 : index
    %2 = vector.load %arg3[%c0_1, %c0_2] : memref<128x256xf32, #tpu.memory_space<vmem>>, vector<128x256xf32>
    %3 = arith.truncf %2 : vector<128x256xf32> to vector<128x256xbf16>
    %cst = arith.constant dense<0.000000e+00> : vector<256x128xf32>
    %4 = tpu.matmul %1, %3, %cst {dimension_numbers = #tpu.dot_dimension_numbers<[1], [1], [0], [0], [0, 0, 1, 0], [], []>} : vector<256x256xbf16>, vector<128x256xbf16>, vector<256x128xf32> -> vector<256x128xf32>
    %cst_3 = arith.constant 0.000000e+00 : f32
    %5 = vector.broadcast %cst_3 : f32 to vector<256x128xf32>
    %6 = arith.maximumf %4, %5 : vector<256x128xf32>
    %c0_4 = arith.constant 0 : index
    %c0_5 = arith.constant 0 : index
    %7 = vector.load %arg4[%c0_4, %c0_5] : memref<256x128xf32, #tpu.memory_space<vmem>>, vector<256x128xf32>
    tpu.vector_store %arg4[%c0_4, %c0_5], %6 {strides = array<i32>} : memref<256x128xf32, #tpu.memory_space<vmem>>, vector<256x128xf32>,
    return
  }
  func.func @transform_0(%arg0: i32, %arg1: i32) -> (i32, i32) {
    %c0_i32 = arith.constant 0 : i32
    %c0_i32_0 = arith.constant 0 : i32
    return %arg0, %c0_i32 : i32, i32
  }
  func.func @transform_1(%arg0: i32, %arg1: i32) -> (i32, i32) {
    %c0_i32 = arith.constant 0 : i32
    %c0_i32_0 = arith.constant 0 : i32
    return %arg1, %c0_i32 : i32, i32
  }
  func.func @transform_2(%arg0: i32, %arg1: i32) -> (i32, i32) {
    %c0_i32 = arith.constant 0 : i32
    return %arg0, %arg1 : i32, i32
  }
}

</mosaic_0001>

<bundles_post_ra>
// kernel: tpu_custom_call.1
= control target key start
LH: loop header
LB: loop body
LE: loop exit
PB: predicated region body
PF: predicated region fallthrough
CT: control target
= control target key end

     0   :  { %7 = vsyncpa [#allocation3], 0  ;;  %s582_s0 = inlined_call_operand.hbm [shape: f32[256,256], index: 0, kind: input, shape index: {}]   ;;  %s583_s1 = inlined_call_operand.hbm [shape: f32[128,256], index: 1, kind: input, shape index: {}]   ;;  %s584_s2 = inlined_call_operand.hbm [shape: f32[256,128], index: 2, kind: output, shape index: {}]  }
   0x1   :  { %8 = vsyncpa [#allocation6], 0 }
   0x2   :  { %9 = vsyncpa [#allocation4], 0  ;;  %s14_s11 = sshll.u32 %s582_s0, 4  ;;  %s551_s12 = smov [#allocation2]   ;;  %s15_s11 = int_to_ptr.hbm [resolvable:$true] %s14_s11 }
   0x3   :  { %s16_s13 = sshll.u32 %s551_s12, 4  ;;  %s27_s16 = sshll.u32 %s583_s1, 4  ;;  %s17_s13 = int_to_ptr.vmem [resolvable:$true] %s16_s13  ;;  %s28_s16 = int_to_ptr.hbm [resolvable:$true] %s27_s16 }
   0x4   :  { %s552_s17 = smov 256   ;;  %s553_s18 = smov 16  }
   0x5   :  { %22 = dma.hbm_to_vmem [thread:$0]  %s15_s11, 8192, %s17_s13, [#allocation3], %s552_s17, %s552_s17, %s553_s18  }
   0x6   :  { %s554_s19 = smov [#allocation5]  }
   0x7   :  { %s29_s20 = sshll.u32 %s554_s19, 4  ;;  %s30_s20 = int_to_ptr.vmem [resolvable:$true] %s29_s20 }
   0x8   :  { %35 = dma.hbm_to_vmem [thread:$0]  %s28_s16, 4096, %s30_s20, [#allocation6], %s552_s17, %s552_s17, %s553_s18  }
   0x9   :  { %545 = dma.done.wait [#allocation3], 8192  }
   0xa   :  { %546 = vsyncadd [#allocation3], 4294959104 }
   0xb   :  { %547 = dma.done.wait [#allocation6], 4096  }
   0xc   :  { %548 = vsyncadd [#allocation6], 4294963200  ;;  %v168_v0 = vld [vmem:[#allocation5 + $0xe0] sm:$0xff]  ;;  %v170_v1 = vld [vmem:[#allocation5 + $0xf0] sm:$0xff]  ;;  %s555_s0 = smov [#allocation7]   ;;  %s436_s23 = sshll.u32 %s584_s2, 4  ;;  %s437_s23 = int_to_ptr.hbm [resolvable:$true] %s436_s23 }
   0xd   :  { %v169_v2 = vld [vmem:[#allocation5 + $0xe8] sm:$0xff]  ;;  %v186_v3 = vpack.c.bf16 %v170_v1, %v168_v0  ;;  %v171_v4 = vld [vmem:[#allocation5 + $0xf8] sm:$0xff]  ;;  %v164_v6 = vld [vmem:[#allocation5 + $0xc0] sm:$0xff]  ;;  %s434_s1 = sshll.u32 %s555_s0, 4  ;;  %s556_s24 = smov 128   ;;  %s435_s1 = int_to_ptr.vmem [resolvable:$true] %s434_s1 }
   0xe   :  { %v187_v5 = vpack.c.bf16 %v171_v4, %v169_v2  ;;  %v166_v7 = vld [vmem:[#allocation5 + $0xd0] sm:$0xff]  ;;  %v165_v8 = vld [vmem:[#allocation5 + $0xc8] sm:$0xff]  ;;  %v167_v9 = vld [vmem:[#allocation5 + $0xd8] sm:$0xff]  ;;  %s557_s25 = smov 8  }
   0xf   :  { %188 = vmatpush.bf16.xpose.msra.mxu0 %v186_v3  ;;  %450 = vmatpush.bf16.xpose.msra.mxu2 %v186_v3  ;;  %v184_v10 = vpack.c.bf16 %v166_v7, %v164_v6  ;;  %v185_v11 = vpack.c.bf16 %v167_v9, %v165_v8  ;;  %v160_v12 = vld [vmem:[#allocation5 + $0xa0] sm:$0xff]  ;;  %v162_v13 = vld [vmem:[#allocation5 + $0xb0] sm:$0xff]  ;;  %v161_v14 = vld [vmem:[#allocation5 + $0xa8] sm:$0xff] }
  0x10   :  { %277 = vmatpush.bf16.xpose.msra.mxu1 %v187_v5  ;;  %458 = vmatpush.bf16.xpose.msra.mxu3 %v187_v5  ;;  %v163_v15 = vld [vmem:[#allocation5 + $0xb8] sm:$0xff]  ;;  %v182_v16 = vpack.c.bf16 %v162_v13, %v160_v12  ;;  %v156_v18 = vld [vmem:[#allocation5 + $0x80] sm:$0xff]  ;;  %v158_v19 = vld [vmem:[#allocation5 + $0x90] sm:$0xff] }
  0x11   :  { %v183_v17 = vpack.c.bf16 %v163_v15, %v161_v14  ;;  %v157_v20 = vld [vmem:[#allocation5 + $0x88] sm:$0xff]  ;;  %v159_v21 = vld [vmem:[#allocation5 + $0x98] sm:$0xff]  ;;  %v180_v22 = vpack.c.bf16 %v158_v19, %v156_v18  ;;  %v152_v24 = vld [vmem:[#allocation5 + $0x60] sm:$0xff] }
  0x12   :  { %v181_v23 = vpack.c.bf16 %v159_v21, %v157_v20  ;;  %v154_v25 = vld [vmem:[#allocation5 + $0x70] sm:$0xff]  ;;  %v153_v26 = vld [vmem:[#allocation5 + $0x68] sm:$0xff]  ;;  %v155_v27 = vld [vmem:[#allocation5 + $0x78] sm:$0xff] }
  0x13   :  { %v178_v28 = vpack.c.bf16 %v154_v25, %v152_v24  ;;  %v179_v29 = vpack.c.bf16 %v155_v27, %v153_v26  ;;  %v148_v30 = vld [vmem:[#allocation5 + $0x40] sm:$0xff]  ;;  %v150_v31 = vld [vmem:[#allocation5 + $0x50] sm:$0xff]  ;;  %v149_v32 = vld [vmem:[#allocation5 + $0x48] sm:$0xff] }
  0x14   :  { %v151_v33 = vld [vmem:[#allocation5 + $0x58] sm:$0xff]  ;;  %v176_v34 = vpack.c.bf16 %v150_v31, %v148_v30  ;;  %v144_v36 = vld [vmem:[#allocation5 + $0x20] sm:$0xff]  ;;  %v146_v37 = vld [vmem:[#allocation5 + $0x30] sm:$0xff] }
  0x15   :  { %v177_v35 = vpack.c.bf16 %v151_v33, %v149_v32  ;;  %v145_v38 = vld [vmem:[#allocation5 + $0x28] sm:$0xff]  ;;  %v147_v39 = vld [vmem:[#allocation5 + $0x38] sm:$0xff]  ;;  %v174_v40 = vpack.c.bf16 %v146_v37, %v144_v36  ;;  %v140_v42 = vld [vmem:[#allocation5] sm:$0xff] }
  0x16   :  { %v175_v41 = vpack.c.bf16 %v147_v39, %v145_v38  ;;  %v142_v43 = vld [vmem:[#allocation5 + $0x10] sm:$0xff]  ;;  %v141_v44 = vld [vmem:[#allocation5 + $0x8] sm:$0xff]  ;;  %v143_v45 = vld [vmem:[#allocation5 + $0x18] sm:$0xff] }
  0x17   :  { %189 = vmatpush.bf16.xpose.msra.mxu0 %v184_v10  ;;  %451 = vmatpush.bf16.xpose.msra.mxu2 %v184_v10  ;;  %v172_v46 = vpack.c.bf16 %v142_v43, %v140_v42  ;;  %v173_v47 = vpack.c.bf16 %v143_v45, %v141_v44  ;;  %v44_v48 = vld [vmem:[#allocation2] sm:$0xff]  ;;  %v46_v49 = vld [vmem:[#allocation2 + $0x10] sm:$0xff]  ;;  %v45_v52 = vld [vmem:[#allocation2 + $0x8] sm:$0xff] }
  0x18   :  { %278 = vmatpush.bf16.xpose.msra.mxu1 %v185_v11  ;;  %459 = vmatpush.bf16.xpose.msra.mxu3 %v185_v11  ;;  %v76_v50 = vld [vmem:[#allocation2 + $0x100] sm:$0xff]  ;;  %v78_v51 = vld [vmem:[#allocation2 + $0x110] sm:$0xff]  ;;  %v47_v53 = vld [vmem:[#allocation2 + $0x18] sm:$0xff]  ;;  %v108_v56 = vpack.c.bf16 %v46_v49, %v44_v48 }
  0x19   :  { %v77_v54 = vld [vmem:[#allocation2 + $0x108] sm:$0xff]  ;;  %v79_v55 = vld [vmem:[#allocation2 + $0x118] sm:$0xff]  ;;  %v124_v57 = vpack.c.bf16 %v78_v51, %v76_v50  ;;  %v109_v58 = vpack.c.bf16 %v47_v53, %v45_v52  ;;  %v48_v60 = vld [vmem:[#allocation2 + $0x20] sm:$0xff] }
  0x1a   :  { %v125_v59 = vpack.c.bf16 %v79_v55, %v77_v54  ;;  %v50_v61 = vld [vmem:[#allocation2 + $0x30] sm:$0xff]  ;;  %v80_v62 = vld [vmem:[#allocation2 + $0x120] sm:$0xff]  ;;  %v49_v0 = vld [vmem:[#allocation2 + $0x28] sm:$0xff] }
  0x1b   :  { %v82_v63 = vld [vmem:[#allocation2 + $0x130] sm:$0xff]  ;;  %v51_v1 = vld [vmem:[#allocation2 + $0x38] sm:$0xff]  ;;  %v81_v2 = vld [vmem:[#allocation2 + $0x128] sm:$0xff]  ;;  %v110_v4 = vpack.c.bf16 %v50_v61, %v48_v60 }
  0x1c   :  { %v83_v3 = vld [vmem:[#allocation2 + $0x138] sm:$0xff]  ;;  %v126_v5 = vpack.c.bf16 %v82_v63, %v80_v62  ;;  %v111_v6 = vpack.c.bf16 %v51_v1, %v49_v0  ;;  %v52_v8 = vld [vmem:[#allocation2 + $0x40] sm:$0xff]  ;;  %v54_v9 = vld [vmem:[#allocation2 + $0x50] sm:$0xff] }
  0x1d   :  { %v127_v7 = vpack.c.bf16 %v83_v3, %v81_v2  ;;  %v84_v10 = vld [vmem:[#allocation2 + $0x140] sm:$0xff]  ;;  %v86_v11 = vld [vmem:[#allocation2 + $0x150] sm:$0xff]  ;;  %v53_v12 = vld [vmem:[#allocation2 + $0x48] sm:$0xff] }
  0x1e   :  { %v55_v13 = vld [vmem:[#allocation2 + $0x58] sm:$0xff]  ;;  %v85_v14 = vld [vmem:[#allocation2 + $0x148] sm:$0xff]  ;;  %v56_v20 = vld [vmem:[#allocation2 + $0x60] sm:$0xff] }
  0x1f   :  { %190 = vmatpush.bf16.xpose.msra.mxu0 %v182_v16  ;;  %452 = vmatpush.bf16.xpose.msra.mxu2 %v182_v16  ;;  %v87_v15 = vld [vmem:[#allocation2 + $0x158] sm:$0xff]  ;;  %v112_v16 = vpack.c.bf16 %v54_v9, %v52_v8  ;;  %v113_v18 = vpack.c.bf16 %v55_v13, %v53_v12  ;;  %v58_v21 = vld [vmem:[#allocation2 + $0x70] sm:$0xff]  ;;  %v57_v24 = vld [vmem:[#allocation2 + $0x68] sm:$0xff] }
  0x20   :  { %279 = vmatpush.bf16.xpose.msra.mxu1 %v183_v17  ;;  %460 = vmatpush.bf16.xpose.msra.mxu3 %v183_v17  ;;  %v128_v17 = vpack.c.bf16 %v86_v11, %v84_v10  ;;  %v129_v19 = vpack.c.bf16 %v87_v15, %v85_v14  ;;  %v59_v25 = vld [vmem:[#allocation2 + $0x78] sm:$0xff]  ;;  %v89_v26 = vld [vmem:[#allocation2 + $0x168] sm:$0xff]  ;;  %v60_v32 = vld [vmem:[#allocation2 + $0x80] sm:$0xff] }
  0x21   :  { %v91_v27 = vld [vmem:[#allocation2 + $0x178] sm:$0xff]  ;;  %v115_v30 = vpack.c.bf16 %v59_v25, %v57_v24  ;;  %v62_v33 = vld [vmem:[#allocation2 + $0x90] sm:$0xff]  ;;  %v61_v36 = vld [vmem:[#allocation2 + $0x88] sm:$0xff] }
  0x22   :  { %v131_v31 = vpack.c.bf16 %v91_v27, %v89_v26  ;;  %v63_v37 = vld [vmem:[#allocation2 + $0x98] sm:$0xff]  ;;  %v93_v38 = vld [vmem:[#allocation2 + $0x188] sm:$0xff]  ;;  %v64_v44 = vld [vmem:[#allocation2 + $0xa0] sm:$0xff] }
  0x23   :  { %v95_v39 = vld [vmem:[#allocation2 + $0x198] sm:$0xff]  ;;  %v117_v42 = vpack.c.bf16 %v63_v37, %v61_v36  ;;  %v66_v45 = vld [vmem:[#allocation2 + $0xb0] sm:$0xff]  ;;  %v65_v48 = vld [vmem:[#allocation2 + $0xa8] sm:$0xff] }
  0x24   :  { %v133_v43 = vpack.c.bf16 %v95_v39, %v93_v38  ;;  %v67_v49 = vld [vmem:[#allocation2 + $0xb8] sm:$0xff]  ;;  %v97_v50 = vld [vmem:[#allocation2 + $0x1a8] sm:$0xff]  ;;  %v118_v52 = vpack.c.bf16 %v66_v45, %v64_v44 }
  0x25   :  { %v99_v51 = vld [vmem:[#allocation2 + $0x1b8] sm:$0xff]  ;;  %v119_v54 = vpack.c.bf16 %v67_v49, %v65_v48  ;;  %v69_v60 = vld [vmem:[#allocation2 + $0xc8] sm:$0xff] }
  0x26   :  { %v135_v55 = vpack.c.bf16 %v99_v51, %v97_v50  ;;  %v71_v61 = vld [vmem:[#allocation2 + $0xd8] sm:$0xff]  ;;  %v101_v62 = vld [vmem:[#allocation2 + $0x1c8] sm:$0xff] }
  0x27   :  { %191 = vmatpush.bf16.xpose.msra.mxu0 %v180_v22  ;;  %453 = vmatpush.bf16.xpose.msra.mxu2 %v180_v22  ;;  %v88_v22 = vld [vmem:[#allocation2 + $0x160] sm:$0xff]  ;;  %v103_v63 = vld [vmem:[#allocation2 + $0x1d8] sm:$0xff]  ;;  %v121_v2 = vpack.c.bf16 %v71_v61, %v69_v60  ;;  %v73_v8 = vld [vmem:[#allocation2 + $0xe8] sm:$0xff] }
  0x28   :  { %280 = vmatpush.bf16.xpose.msra.mxu1 %v181_v23  ;;  %461 = vmatpush.bf16.xpose.msra.mxu3 %v181_v23  ;;  %v90_v23 = vld [vmem:[#allocation2 + $0x170] sm:$0xff]  ;;  %v137_v3 = vpack.c.bf16 %v103_v63, %v101_v62  ;;  %v75_v9 = vld [vmem:[#allocation2 + $0xf8] sm:$0xff]  ;;  %v105_v10 = vld [vmem:[#allocation2 + $0x1e8] sm:$0xff] }
  0x29   :  { %v107_v11 = vld [vmem:[#allocation2 + $0x1f8] sm:$0xff]  ;;  %v123_v14 = vpack.c.bf16 %v75_v9, %v73_v8 }
  0x2a   :  { %v139_v15 = vpack.c.bf16 %v107_v11, %v105_v10 }
  0x2f   :  { %192 = vmatpush.bf16.xpose.msra.mxu0 %v178_v28  ;;  %454 = vmatpush.bf16.xpose.msra.mxu2 %v178_v28  ;;  %v114_v28 = vpack.c.bf16 %v58_v21, %v56_v20 }
  0x30   :  { %281 = vmatpush.bf16.xpose.msra.mxu1 %v179_v29  ;;  %462 = vmatpush.bf16.xpose.msra.mxu3 %v179_v29  ;;  %v130_v29 = vpack.c.bf16 %v90_v23, %v88_v22 }
  0x37   :  { %193 = vmatpush.bf16.xpose.msra.mxu0 %v176_v34  ;;  %455 = vmatpush.bf16.xpose.msra.mxu2 %v176_v34  ;;  %v92_v34 = vld [vmem:[#allocation2 + $0x180] sm:$0xff] }
  0x38   :  { %282 = vmatpush.bf16.xpose.msra.mxu1 %v177_v35  ;;  %463 = vmatpush.bf16.xpose.msra.mxu3 %v177_v35  ;;  %v94_v35 = vld [vmem:[#allocation2 + $0x190] sm:$0xff] }
  0x3f   :  { %194 = vmatpush.bf16.xpose.msra.mxu0 %v174_v40  ;;  %456 = vmatpush.bf16.xpose.msra.mxu2 %v174_v40  ;;  %v116_v40 = vpack.c.bf16 %v62_v33, %v60_v32 }
  0x40   :  { %283 = vmatpush.bf16.xpose.msra.mxu1 %v175_v41  ;;  %464 = vmatpush.bf16.xpose.msra.mxu3 %v175_v41  ;;  %v132_v41 = vpack.c.bf16 %v94_v35, %v92_v34 }
  0x47   :  { %195 = vmatpush.bf16.xpose.msra.mxu0 %v172_v46  ;;  %457 = vmatpush.bf16.xpose.msra.mxu2 %v172_v46  ;;  %v96_v46 = vld [vmem:[#allocation2 + $0x1a0] sm:$0xff] }
  0x48   :  { %284 = vmatpush.bf16.xpose.msra.mxu1 %v173_v47  ;;  %465 = vmatpush.bf16.xpose.msra.mxu3 %v173_v47  ;;  %v98_v47 = vld [vmem:[#allocation2 + $0x1b0] sm:$0xff] }
  0x49   :  { %v134_v53 = vpack.c.bf16 %v98_v47, %v96_v46 }
  0x4e   :  { %196 = vmatmul.bf16.vlgmr.msra.gmra.mxu0 %v108_v56  ;;  %236 = vmatmul.bf16.vlgmr.msra.gmra.mxu2 %v124_v57  ;;  %v68_v56 = vld [vmem:[#allocation2 + $0xc0] sm:$0xff]  ;;  %v70_v57 = vld [vmem:[#allocation2 + $0xd0] sm:$0xff] }
  0x4f   :  { %285 = vmatmul.bf16.vlgmr.msra.gmra.mxu1 %v109_v58  ;;  %325 = vmatmul.bf16.vlgmr.msra.gmra.mxu3 %v125_v59  ;;  %v100_v58 = vld [vmem:[#allocation2 + $0x1c0] sm:$0xff]  ;;  %v102_v59 = vld [vmem:[#allocation2 + $0x1d0] sm:$0xff]  ;;  %v120_v0 = vpack.c.bf16 %v70_v57, %v68_v56 }
  0x50   :  { %v136_v1 = vpack.c.bf16 %v102_v59, %v100_v58 }
  0x5e   :  { %201 = vmatmul.bf16.gmra.mxu0 %v110_v4  ;;  %241 = vmatmul.bf16.gmra.mxu2 %v126_v5  ;;  %v72_v4 = vld [vmem:[#allocation2 + $0xe0] sm:$0xff]  ;;  %v74_v5 = vld [vmem:[#allocation2 + $0xf0] sm:$0xff] }
  0x5f   :  { %290 = vmatmul.bf16.gmra.mxu1 %v111_v6  ;;  %330 = vmatmul.bf16.gmra.mxu3 %v127_v7  ;;  %v104_v6 = vld [vmem:[#allocation2 + $0x1e0] sm:$0xff]  ;;  %v106_v7 = vld [vmem:[#allocation2 + $0x1f0] sm:$0xff]  ;;  %v122_v12 = vpack.c.bf16 %v74_v5, %v72_v4 }
  0x60   :  { %v138_v13 = vpack.c.bf16 %v106_v7, %v104_v6 }
  0x6e   :  { %206 = vmatmul.bf16.gmra.mxu0 %v112_v16  ;;  %246 = vmatmul.bf16.gmra.mxu2 %v128_v17 }
  0x6f   :  { %295 = vmatmul.bf16.gmra.mxu1 %v113_v18  ;;  %335 = vmatmul.bf16.gmra.mxu3 %v129_v19 }
  0x7e   :  { %211 = vmatmul.bf16.gmra.mxu0 %v114_v28  ;;  %251 = vmatmul.bf16.gmra.mxu2 %v130_v29 }
  0x7f   :  { %300 = vmatmul.bf16.gmra.mxu1 %v115_v30  ;;  %340 = vmatmul.bf16.gmra.mxu3 %v131_v31 }
  0x8e   :  { %216 = vmatmul.bf16.gmra.mxu0 %v116_v40  ;;  %256 = vmatmul.bf16.gmra.mxu2 %v132_v41 }
  0x8f   :  { %305 = vmatmul.bf16.gmra.mxu1 %v117_v42  ;;  %345 = vmatmul.bf16.gmra.mxu3 %v133_v43 }
  0x9e   :  { %221 = vmatmul.bf16.gmra.mxu0 %v118_v52  ;;  %261 = vmatmul.bf16.gmra.mxu2 %v134_v53 }
  0x9f   :  { %310 = vmatmul.bf16.gmra.mxu1 %v119_v54  ;;  %350 = vmatmul.bf16.gmra.mxu3 %v135_v55 }
  0xae   :  { %226 = vmatmul.bf16.gmra.mxu0 %v120_v0  ;;  %266 = vmatmul.bf16.gmra.mxu2 %v136_v1 }
  0xaf   :  { %315 = vmatmul.bf16.gmra.mxu1 %v121_v2  ;;  %355 = vmatmul.bf16.gmra.mxu3 %v137_v3 }
  0xbe   :  { %231 = vmatmul.bf16.gmra.mxu0 %v122_v12  ;;  %271 = vmatmul.bf16.gmra.mxu2 %v138_v13 }
  0xbf   :  { %320 = vmatmul.bf16.gmra.mxu1 %v123_v14  ;;  %360 = vmatmul.bf16.gmra.mxu3 %v139_v15 }
  0xcb   :  { %v197_v16 = vpop.f32.mrf.mxu0 }
  0xcc   :  { %v286_v17 = vpop.f32.mrf.mxu1 }
  0xcd   :  { %v287_v18 = vadd.f32 %v286_v17, %v197_v16 }
  0xcf   :  { %v366_v19 = vmax.f32 %v287_v18, 0.0 }
  0xd1   :  { %398 = vst [vmem:[#allocation7] sm:$0xff] %v366_v19  ;;  %v237_v20 = vpop.f32.mrf.mxu2 }
  0xd2   :  { %v326_v21 = vpop.f32.mrf.mxu3 }
  0xd3   :  { %v327_v22 = vadd.f32 %v326_v21, %v237_v20  ;;  %v199_v23 = vpop.f32.mrf.mxu0 }
  0xd4   :  { %v288_v24 = vpop.f32.mrf.mxu1 }
  0xd5   :  { %v382_v25 = vmax.f32 %v327_v22, 0.0  ;;  %v289_v26 = vadd.f32 %v288_v24, %v199_v23 }
  0xd7   :  { %414 = vst [vmem:[#allocation7 + $0x80] sm:$0xff] %v382_v25  ;;  %v367_v27 = vmax.f32 %v289_v26, 0.0 }
  0xd9   :  { %399 = vst [vmem:[#allocation7 + $0x8] sm:$0xff] %v367_v27  ;;  %v239_v28 = vpop.f32.mrf.mxu2 }
  0xda   :  { %v328_v29 = vpop.f32.mrf.mxu3 }
  0xdb   :  { %v329_v30 = vadd.f32 %v328_v29, %v239_v28  ;;  %v202_v31 = vpop.f32.mrf.mxu0 }
  0xdc   :  { %v291_v32 = vpop.f32.mrf.mxu1 }
  0xdd   :  { %v383_v33 = vmax.f32 %v329_v30, 0.0  ;;  %v292_v34 = vadd.f32 %v291_v32, %v202_v31 }
  0xdf   :  { %415 = vst [vmem:[#allocation7 + $0x88] sm:$0xff] %v383_v33  ;;  %v368_v35 = vmax.f32 %v292_v34, 0.0 }
  0xe1   :  { %400 = vst [vmem:[#allocation7 + $0x10] sm:$0xff] %v368_v35  ;;  %v242_v36 = vpop.f32.mrf.mxu2 }
  0xe2   :  { %v331_v37 = vpop.f32.mrf.mxu3 }
  0xe3   :  { %v332_v38 = vadd.f32 %v331_v37, %v242_v36  ;;  %v204_v39 = vpop.f32.mrf.mxu0 }
  0xe4   :  { %v293_v40 = vpop.f32.mrf.mxu1 }
  0xe5   :  { %v384_v41 = vmax.f32 %v332_v38, 0.0  ;;  %v294_v42 = vadd.f32 %v293_v40, %v204_v39 }
  0xe7   :  { %416 = vst [vmem:[#allocation7 + $0x90] sm:$0xff] %v384_v41  ;;  %v369_v43 = vmax.f32 %v294_v42, 0.0 }
  0xe9   :  { %401 = vst [vmem:[#allocation7 + $0x18] sm:$0xff] %v369_v43  ;;  %v244_v44 = vpop.f32.mrf.mxu2 }
  0xea   :  { %v333_v45 = vpop.f32.mrf.mxu3 }
  0xeb   :  { %v334_v46 = vadd.f32 %v333_v45, %v244_v44  ;;  %v207_v47 = vpop.f32.mrf.mxu0 }
  0xec   :  { %v296_v48 = vpop.f32.mrf.mxu1 }
  0xed   :  { %v385_v49 = vmax.f32 %v334_v46, 0.0  ;;  %v297_v50 = vadd.f32 %v296_v48, %v207_v47 }
  0xef   :  { %417 = vst [vmem:[#allocation7 + $0x98] sm:$0xff] %v385_v49  ;;  %v370_v51 = vmax.f32 %v297_v50, 0.0 }
  0xf1   :  { %402 = vst [vmem:[#allocation7 + $0x20] sm:$0xff] %v370_v51  ;;  %v247_v52 = vpop.f32.mrf.mxu2 }
  0xf2   :  { %v336_v53 = vpop.f32.mrf.mxu3 }
  0xf3   :  { %v337_v54 = vadd.f32 %v336_v53, %v247_v52  ;;  %v209_v55 = vpop.f32.mrf.mxu0 }
  0xf4   :  { %v298_v56 = vpop.f32.mrf.mxu1 }
  0xf5   :  { %v386_v57 = vmax.f32 %v337_v54, 0.0  ;;  %v299_v58 = vadd.f32 %v298_v56, %v209_v55 }
  0xf7   :  { %418 = vst [vmem:[#allocation7 + $0xa0] sm:$0xff] %v386_v57  ;;  %v371_v59 = vmax.f32 %v299_v58, 0.0 }
  0xf9   :  { %403 = vst [vmem:[#allocation7 + $0x28] sm:$0xff] %v371_v59  ;;  %v249_v60 = vpop.f32.mrf.mxu2 }
  0xfa   :  { %v338_v61 = vpop.f32.mrf.mxu3 }
  0xfb   :  { %v339_v62 = vadd.f32 %v338_v61, %v249_v60  ;;  %v212_v63 = vpop.f32.mrf.mxu0 }
  0xfc   :  { %v301_v0 = vpop.f32.mrf.mxu1 }
  0xfd   :  { %v387_v1 = vmax.f32 %v339_v62, 0.0  ;;  %v302_v2 = vadd.f32 %v301_v0, %v212_v63 }
  0xff   :  { %419 = vst [vmem:[#allocation7 + $0xa8] sm:$0xff] %v387_v1  ;;  %v372_v3 = vmax.f32 %v302_v2, 0.0 }
 0x101   :  { %404 = vst [vmem:[#allocation7 + $0x30] sm:$0xff] %v372_v3  ;;  %v252_v4 = vpop.f32.mrf.mxu2 }
 0x102   :  { %v341_v5 = vpop.f32.mrf.mxu3 }
 0x103   :  { %v342_v6 = vadd.f32 %v341_v5, %v252_v4  ;;  %v214_v7 = vpop.f32.mrf.mxu0 }
 0x104   :  { %v303_v8 = vpop.f32.mrf.mxu1 }
 0x105   :  { %v388_v9 = vmax.f32 %v342_v6, 0.0  ;;  %v304_v10 = vadd.f32 %v303_v8, %v214_v7 }
 0x107   :  { %420 = vst [vmem:[#allocation7 + $0xb0] sm:$0xff] %v388_v9  ;;  %v373_v11 = vmax.f32 %v304_v10, 0.0 }
 0x109   :  { %405 = vst [vmem:[#allocation7 + $0x38] sm:$0xff] %v373_v11  ;;  %v254_v12 = vpop.f32.mrf.mxu2 }
 0x10a   :  { %v343_v13 = vpop.f32.mrf.mxu3 }
 0x10b   :  { %v344_v14 = vadd.f32 %v343_v13, %v254_v12  ;;  %v217_v15 = vpop.f32.mrf.mxu0 }
 0x10c   :  { %v306_v16 = vpop.f32.mrf.mxu1 }
 0x10d   :  { %v389_v17 = vmax.f32 %v344_v14, 0.0  ;;  %v307_v18 = vadd.f32 %v306_v16, %v217_v15 }
 0x10f   :  { %421 = vst [vmem:[#allocation7 + $0xb8] sm:$0xff] %v389_v17  ;;  %v374_v19 = vmax.f32 %v307_v18, 0.0 }
 0x111   :  { %406 = vst [vmem:[#allocation7 + $0x40] sm:$0xff] %v374_v19  ;;  %v257_v20 = vpop.f32.mrf.mxu2 }
 0x112   :  { %v346_v21 = vpop.f32.mrf.mxu3 }
 0x113   :  { %v347_v22 = vadd.f32 %v346_v21, %v257_v20  ;;  %v219_v23 = vpop.f32.mrf.mxu0 }
 0x114   :  { %v308_v24 = vpop.f32.mrf.mxu1 }
 0x115   :  { %v390_v25 = vmax.f32 %v347_v22, 0.0  ;;  %v309_v26 = vadd.f32 %v308_v24, %v219_v23 }
 0x117   :  { %422 = vst [vmem:[#allocation7 + $0xc0] sm:$0xff] %v390_v25  ;;  %v375_v27 = vmax.f32 %v309_v26, 0.0 }
 0x119   :  { %407 = vst [vmem:[#allocation7 + $0x48] sm:$0xff] %v375_v27  ;;  %v259_v28 = vpop.f32.mrf.mxu2 }
 0x11a   :  { %v348_v29 = vpop.f32.mrf.mxu3 }
 0x11b   :  { %v349_v30 = vadd.f32 %v348_v29, %v259_v28  ;;  %v222_v31 = vpop.f32.mrf.mxu0 }
 0x11c   :  { %v311_v32 = vpop.f32.mrf.mxu1 }
 0x11d   :  { %v391_v33 = vmax.f32 %v349_v30, 0.0  ;;  %v312_v34 = vadd.f32 %v311_v32, %v222_v31 }
 0x11f   :  { %423 = vst [vmem:[#allocation7 + $0xc8] sm:$0xff] %v391_v33  ;;  %v376_v35 = vmax.f32 %v312_v34, 0.0 }
 0x121   :  { %408 = vst [vmem:[#allocation7 + $0x50] sm:$0xff] %v376_v35  ;;  %v262_v36 = vpop.f32.mrf.mxu2 }
 0x122   :  { %v351_v37 = vpop.f32.mrf.mxu3 }
 0x123   :  { %v352_v38 = vadd.f32 %v351_v37, %v262_v36  ;;  %v224_v39 = vpop.f32.mrf.mxu0 }
 0x124   :  { %v313_v40 = vpop.f32.mrf.mxu1 }
 0x125   :  { %v392_v41 = vmax.f32 %v352_v38, 0.0  ;;  %v314_v42 = vadd.f32 %v313_v40, %v224_v39 }
 0x127   :  { %424 = vst [vmem:[#allocation7 + $0xd0] sm:$0xff] %v392_v41  ;;  %v377_v43 = vmax.f32 %v314_v42, 0.0 }
 0x129   :  { %409 = vst [vmem:[#allocation7 + $0x58] sm:$0xff] %v377_v43  ;;  %v264_v44 = vpop.f32.mrf.mxu2 }
 0x12a   :  { %v353_v45 = vpop.f32.mrf.mxu3 }
 0x12b   :  { %v354_v46 = vadd.f32 %v353_v45, %v264_v44  ;;  %v227_v47 = vpop.f32.mrf.mxu0 }
 0x12c   :  { %v316_v48 = vpop.f32.mrf.mxu1 }
 0x12d   :  { %v393_v49 = vmax.f32 %v354_v46, 0.0  ;;  %v317_v50 = vadd.f32 %v316_v48, %v227_v47 }
 0x12f   :  { %425 = vst [vmem:[#allocation7 + $0xd8] sm:$0xff] %v393_v49  ;;  %v378_v51 = vmax.f32 %v317_v50, 0.0 }
 0x131   :  { %410 = vst [vmem:[#allocation7 + $0x60] sm:$0xff] %v378_v51  ;;  %v267_v52 = vpop.f32.mrf.mxu2 }
 0x132   :  { %v356_v53 = vpop.f32.mrf.mxu3 }
 0x133   :  { %v357_v54 = vadd.f32 %v356_v53, %v267_v52  ;;  %v229_v55 = vpop.f32.mrf.mxu0 }
 0x134   :  { %v318_v56 = vpop.f32.mrf.mxu1 }
 0x135   :  { %v394_v57 = vmax.f32 %v357_v54, 0.0  ;;  %v319_v58 = vadd.f32 %v318_v56, %v229_v55 }
 0x137   :  { %426 = vst [vmem:[#allocation7 + $0xe0] sm:$0xff] %v394_v57  ;;  %v379_v59 = vmax.f32 %v319_v58, 0.0 }
 0x139   :  { %411 = vst [vmem:[#allocation7 + $0x68] sm:$0xff] %v379_v59  ;;  %v269_v60 = vpop.f32.mrf.mxu2 }
 0x13a   :  { %v358_v61 = vpop.f32.mrf.mxu3 }
 0x13b   :  { %v359_v62 = vadd.f32 %v358_v61, %v269_v60  ;;  %v232_v63 = vpop.f32.mrf.mxu0 }
 0x13c   :  { %v321_v0 = vpop.f32.mrf.mxu1 }
 0x13d   :  { %v395_v1 = vmax.f32 %v359_v62, 0.0  ;;  %v322_v2 = vadd.f32 %v321_v0, %v232_v63 }
 0x13f   :  { %427 = vst [vmem:[#allocation7 + $0xe8] sm:$0xff] %v395_v1  ;;  %v380_v3 = vmax.f32 %v322_v2, 0.0 }
 0x141   :  { %412 = vst [vmem:[#allocation7 + $0x70] sm:$0xff] %v380_v3  ;;  %v272_v4 = vpop.f32.mrf.mxu2 }
 0x142   :  { %v361_v5 = vpop.f32.mrf.mxu3 }
 0x143   :  { %v362_v6 = vadd.f32 %v361_v5, %v272_v4  ;;  %v234_v7 = vpop.f32.mrf.mxu0 }
 0x144   :  { %v323_v8 = vpop.f32.mrf.mxu1 }
 0x145   :  { %v396_v9 = vmax.f32 %v362_v6, 0.0  ;;  %v324_v10 = vadd.f32 %v323_v8, %v234_v7 }
 0x147   :  { %428 = vst [vmem:[#allocation7 + $0xf0] sm:$0xff] %v396_v9  ;;  %v381_v11 = vmax.f32 %v324_v10, 0.0 }
 0x149   :  { %413 = vst [vmem:[#allocation7 + $0x78] sm:$0xff] %v381_v11  ;;  %v274_v12 = vpop.f32.mrf.mxu2 }
 0x14a   :  { %v363_v13 = vpop.f32.mrf.mxu3 }
 0x14b   :  { %v364_v14 = vadd.f32 %v363_v13, %v274_v12 }
 0x14d   :  { %v397_v15 = vmax.f32 %v364_v14, 0.0 }
 0x14f   :  { %429 = vst [vmem:[#allocation7 + $0xf8] sm:$0xff] %v397_v15 }
 0x150   :  { %442 = dma.vmem_to_hbm [thread:$0]  %s435_s1, 4096, %s437_s23, [#allocation4], %s556_s24, %s556_s24, %s557_s25  }
 0x151   :  { %549 = dma.done.wait [#allocation4], 4096  }
 0x152   :  { %550 = vsyncadd [#allocation4], 4294963200 }
 0x153   :  { %447 = vsyncpa [#allocation3], 1 }
 0x154   :  { %448 = vsyncpa [#allocation6], 1 }
 0x155   :  { %449 = vsyncpa [#allocation4], 1 }

</bundles_post_ra>
